<compile_context>
chip_gen: v5e
topology: v5e:2x2
jax: 0.10.0
libtpu: 0.0.40
codegen_flags: <defaults>
</compile_context>

<pallas_src>
import jax
import jax.numpy as jnp
from jax.experimental import pallas as pl
from jax.experimental.pallas import tpu as pltpu


def _matmul_model_kernel(x_ref, w1a_ref, w1b_ref, w3_ref, o_ref):
    # x_ref:  [TM, 2n^2]   w1a/w1b: [2n^2, k]   w3_ref: [k, n^2]   o_ref: [TM, n^2]
    x = x_ref[...]
    ha = jnp.dot(x, w1a_ref[...], preferred_element_type=jnp.float32)  # [TM, k]
    hb = jnp.dot(x, w1b_ref[...], preferred_element_type=jnp.float32)  # [TM, k]
    g = ha * hb                                                        # gate in f32
    y = jnp.dot(g, w3_ref[...], preferred_element_type=jnp.float32)    # [TM, n^2]
    o_ref[...] = y.astype(o_ref.dtype)


def _round_up(x, m):
    return (x + m - 1) // m * m


def matmul_model_forward(x, w1, w3, *, block_b=1024):
    """Fused forward for MatmulModel.

    x:  [B, 2*n^2]  activations
    w1: [2k, 2*n^2] torch layer1.weight layout
    w3: [n^2, k]    torch layer3.weight layout
    returns [B, n^2]
    """
    B, in_dim = x.shape
    two_k = w1.shape[0]
    k = two_k // 2
    out_dim = w3.shape[0]

    # One-time weight prep in plain JAX (outside the kernel):
    #   split W1.T into two [2n^2, k] halves -> gate is a per-lane multiply,
    #   transpose W3 -> row-major MXU matmul.
    w1_t = w1.T                 # [2n^2, 2k]
    w1a = w1_t[:, :k]           # [2n^2, k]
    w1b = w1_t[:, k:]           # [2n^2, k]
    w3_t = w3.T                 # [k, n^2]

    # Batch tiling: large sublane tiles (multiple of 8 for f32), zero-pad tail.
    tm = max(8, min(_round_up(block_b, 8), _round_up(B, 8)))
    b_pad = _round_up(B, tm)
    if b_pad != B:
        x = jnp.pad(x, ((0, b_pad - B), (0, 0)))  # zero rows -> zero outputs

    grid = (b_pad // tm,)

    flops = 2 * B * (in_dim * two_k + k * out_dim)
    bytes_accessed = 4 * (b_pad * in_dim + w1.size + w3.size + b_pad * out_dim)
    cost = pl.CostEstimate(flops=flops, transcendentals=0,
                           bytes_accessed=bytes_accessed)

    y = pl.pallas_call(
        _matmul_model_kernel,
        out_shape=jax.ShapeDtypeStruct((b_pad, out_dim), x.dtype),
        grid=grid,
        in_specs=[
            # x streamed over batch (double-buffered by Pallas).
            pl.BlockSpec((tm, in_dim), lambda i: (i, 0)),
            # Weights: constant index_map -> DMA'd once, resident across steps.
            pl.BlockSpec((in_dim, k), lambda i: (0, 0)),
            pl.BlockSpec((in_dim, k), lambda i: (0, 0)),
            pl.BlockSpec((k, out_dim), lambda i: (0, 0)),
        ],
        out_specs=pl.BlockSpec((tm, out_dim), lambda i: (i, 0)),
        compiler_params=pltpu.CompilerParams(
            dimension_semantics=("parallel",),  # megacore sharding on v7x
        ),
        cost_estimate=cost,
    )(x, w1a, w1b, w3_t)

    return y[:B]


if __name__ == "__main__":
    # Small shapes consistent with the module: n=4, k=8
    n, k = 4, 8
    B = 8
    in_dim = 2 * n * n      # 32
    hid_dim = 2 * k         # 16
    out_dim = n * n         # 16

    key = jax.random.PRNGKey(0)
    kx, k1, k3 = jax.random.split(key, 3)

    x = jax.random.normal(kx, (B, in_dim), dtype=jnp.float32)

    # Deterministic parameter init (mimics nn.Linear's Kaiming-uniform bound).
    bound1 = 1.0 / (in_dim ** 0.5)
    bound3 = 1.0 / (k ** 0.5)
    w1 = jax.random.uniform(k1, (hid_dim, in_dim), jnp.float32, -bound1, bound1)  # [2k, 2n^2]
    w3 = jax.random.uniform(k3, (out_dim, k), jnp.float32, -bound3, bound3)       # [n^2, k]

    y = matmul_model_forward(x, w1, w3)
    y = jax.block_until_ready(y)

    # Pure-JAX reference of the same semantics.
    h_ref = x @ w1.T
    y_ref = (h_ref[:, :k] * h_ref[:, k:]) @ w3.T
    assert y.shape == (B, out_dim)
    assert jnp.allclose(y, y_ref, atol=1e-5, rtol=1e-5)

    print("KERNEL_OK")
</pallas_src>

<mosaic_0001>
module attributes {stable_mosaic.version = 11 : i64} {
  func.func @_matmul_model_kernel(%arg0: i32, %arg1: memref<8x32xf32, #tpu.memory_space<vmem>>, %arg2: memref<32x8xf32, #tpu.memory_space<vmem>>, %arg3: memref<32x8xf32, #tpu.memory_space<vmem>>, %arg4: memref<8x16xf32, #tpu.memory_space<vmem>>, %arg5: memref<8x16xf32, #tpu.memory_space<vmem>>) attributes {dimension_semantics = [#tpu.dimension_semantics<parallel>], iteration_bounds = array<i64: 1>, scalar_prefetch = 0 : i64, scratch_operands = 0 : i64, tpu.core_type = #tpu.core_type<tc>, window_params = [{transform_indices = @transform_0, window_bounds = array<i64: 8, 32>}, {pipeline_mode = #tpu.pipeline_mode<synchronous>, transform_indices = @transform_1, window_bounds = array<i64: 32, 8>}, {pipeline_mode = #tpu.pipeline_mode<synchronous>, transform_indices = @transform_2, window_bounds = array<i64: 32, 8>}, {pipeline_mode = #tpu.pipeline_mode<synchronous>, transform_indices = @transform_3, window_bounds = array<i64: 8, 16>}, {transform_indices = @transform_4, window_bounds = array<i64: 8, 16>}]} {
    %c0 = arith.constant 0 : index
    %c0_0 = arith.constant 0 : index
    %0 = vector.load %arg1[%c0, %c0_0] : memref<8x32xf32, #tpu.memory_space<vmem>>, vector<8x32xf32>
    %c0_1 = arith.constant 0 : index
    %c0_2 = arith.constant 0 : index
    %1 = vector.load %arg2[%c0_1, %c0_2] : memref<32x8xf32, #tpu.memory_space<vmem>>, vector<32x8xf32>
    %cst = arith.constant dense<0.000000e+00> : vector<8x8xf32>
    %2 = tpu.matmul %0, %1, %cst {dimension_numbers = #tpu.dot_dimension_numbers<[1], [0], [0], [1], [0, 0, 1, 1], [], []>} : vector<8x32xf32>, vector<32x8xf32>, vector<8x8xf32> -> vector<8x8xf32>
    %c0_3 = arith.constant 0 : index
    %c0_4 = arith.constant 0 : index
    %3 = vector.load %arg3[%c0_3, %c0_4] : memref<32x8xf32, #tpu.memory_space<vmem>>, vector<32x8xf32>
    %cst_5 = arith.constant dense<0.000000e+00> : vector<8x8xf32>
    %4 = tpu.matmul %0, %3, %cst_5 {dimension_numbers = #tpu.dot_dimension_numbers<[1], [0], [0], [1], [0, 0, 1, 1], [], []>} : vector<8x32xf32>, vector<32x8xf32>, vector<8x8xf32> -> vector<8x8xf32>
    %5 = arith.mulf %2, %4 : vector<8x8xf32>
    %c0_6 = arith.constant 0 : index
    %c0_7 = arith.constant 0 : index
    %6 = vector.load %arg4[%c0_6, %c0_7] : memref<8x16xf32, #tpu.memory_space<vmem>>, vector<8x16xf32>
    %cst_8 = arith.constant dense<0.000000e+00> : vector<8x16xf32>
    %7 = tpu.matmul %5, %6, %cst_8 {dimension_numbers = #tpu.dot_dimension_numbers<[1], [0], [0], [1], [0, 0, 1, 1], [], []>} : vector<8x8xf32>, vector<8x16xf32>, vector<8x16xf32> -> vector<8x16xf32>
    %c0_9 = arith.constant 0 : index
    %c0_10 = arith.constant 0 : index
    %8 = vector.load %arg5[%c0_9, %c0_10] : memref<8x16xf32, #tpu.memory_space<vmem>>, vector<8x16xf32>
    tpu.vector_store %arg5[%c0_9, %c0_10], %7 {strides = array<i32>} : memref<8x16xf32, #tpu.memory_space<vmem>>, vector<8x16xf32>,
    return
  }
  func.func @transform_0(%arg0: i32) -> (i32, i32) {
    %c0_i32 = arith.constant 0 : i32
    %c0_i32_0 = arith.constant 0 : i32
    return %arg0, %c0_i32 : i32, i32
  }
  func.func @transform_1(%arg0: i32) -> (i32, i32) {
    %c0_i32 = arith.constant 0 : i32
    %c0_i32_0 = arith.constant 0 : i32
    %c0_i32_1 = arith.constant 0 : i32
    return %c0_i32, %c0_i32_0 : i32, i32
  }
  func.func @transform_2(%arg0: i32) -> (i32, i32) {
    %c0_i32 = arith.constant 0 : i32
    %c0_i32_0 = arith.constant 0 : i32
    %c0_i32_1 = arith.constant 0 : i32
    return %c0_i32, %c0_i32_0 : i32, i32
  }
  func.func @transform_3(%arg0: i32) -> (i32, i32) {
    %c0_i32 = arith.constant 0 : i32
    %c0_i32_0 = arith.constant 0 : i32
    %c0_i32_1 = arith.constant 0 : i32
    return %c0_i32, %c0_i32_0 : i32, i32
  }
  func.func @transform_4(%arg0: i32) -> (i32, i32) {
    %c0_i32 = arith.constant 0 : i32
    %c0_i32_0 = arith.constant 0 : i32
    return %arg0, %c0_i32 : i32, i32
  }
}

</mosaic_0001>

<bundles_post_ra>
// kernel: tpu_custom_call.1
= control target key start
LH: loop header
LB: loop body
LE: loop exit
PB: predicated region body
PF: predicated region fallthrough
CT: control target
= control target key end

     0   :  { %s204_s0 = inlined_call_operand.vmem [shape: f32[8,32], index: 0, kind: input, shape index: {}]   ;;  %s205_s1 = inlined_call_operand.vmem [shape: f32[32,8], index: 1, kind: input, shape index: {}]   ;;  %s206_s2 = inlined_call_operand.vmem [shape: f32[32,8], index: 2, kind: input, shape index: {}]   ;;  %s207_s3 = inlined_call_operand.vmem [shape: f32[8,16], index: 3, kind: input, shape index: {}]   ;;  %s208_s4 = inlined_call_operand.hbm [shape: f32[8,16], index: 4, kind: output, shape index: {}]  }
   0x1   :  { %v22_v0 = vld [vmem:[%s205_s1 + $0x18] sm:$0xff]  ;;  %v21_v2 = vld [vmem:[%s205_s1 + $0x10] sm:$0xff]  ;;  %v20_v4 = vld [vmem:[%s205_s1 + $0x8] sm:$0xff] }
   0x2   :  { %v50_v1 = vld [vmem:[%s206_s2 + $0x18] sm:$0xff]  ;;  %39 = vmatpush.msra.mxu0 %v22_v0  ;;  %v49_v3 = vld [vmem:[%s206_s2 + $0x10] sm:$0xff]  ;;  %v48_v5 = vld [vmem:[%s206_s2 + $0x8] sm:$0xff] }
   0x3   :  { %63 = vmatpush.msra.mxu1 %v50_v1 }
   0x4   :  { %40 = vmatpush.msra.mxu0 %v21_v2 }
   0x5   :  { %64 = vmatpush.msra.mxu1 %v49_v3 }
   0x6   :  { %9 = vsyncpa [#allocation3], 0  ;;  %v19_v6 = vld [vmem:[%s205_s1] sm:$0xff]  ;;  %41 = vmatpush.msra.mxu0 %v20_v4  ;;  %vm23_vm0 = vcmask 261120   ;;  %vm73_vm1 = vcmask 64512   ;;  %s145_s1 = smov [#allocation2]  }
   0x7   :  { %v47_v7 = vld [vmem:[%s206_s2] sm:$0xff]  ;;  %65 = vmatpush.msra.mxu1 %v48_v5  ;;  %s104_s2 = sshll.u32 %s145_s1, 4  ;;  %vm97_vm2 = vcmask 130048   ;;  %s105_s2 = int_to_ptr.vmem [resolvable:$true] %s104_s2 }
   0x8   :  { %v18_v8 = vld [vmem:[%s204_s0] sm:$0xff]  ;;  %42 = vmatpush.msra.mxu0 %v19_v6  ;;  %s106_s0 = sshll.u32 %s208_s4, 4  ;;  %s107_s0 = int_to_ptr.hbm [resolvable:$true] %s106_s0 }
   0x9   :  { %66 = vmatpush.msra.mxu1 %v47_v7  ;;  %115 = vmatmul.msk.f32.vlgmr.msra.gmra.mxu0 %vm23_vm0, %v18_v8  ;;  %v72_v9 = vld [vmem:[%s207_s3] sm:$0xff] }
   0xa   :  { %116 = vmatmul.msk.f32.vlgmr.msra.gmra.mxu1 %vm23_vm0, %v18_v8  ;;  %92 = vmatpush.msra.mxu2 %v72_v9 }
  0x86   :  { %v44_v10 = vpop.f32.mrf.mxu0 }
  0x87   :  { %v68_v11 = vpop.f32.mrf.mxu1 }
  0x88   :  { %v71_v12 = vmul.f32 %v68_v11, %v44_v10 }
  0x8a   :  { %117 = vmatmul.msk.f32.vlgmr.msra.gmra.mxu2 %vm73_vm1, %v71_v12 }
 0x10d   :  { %v94_v13 = vpop.f32.mrf.mxu2 }
 0x10e   :  { %98 = vst.msk [vmem:[#allocation2] sm:$0xff] %vm97_vm2, %v94_v13 }
 0x10f   :  { %109 = dma.vmem_to_hbm [thread:$0]  %s105_s2, 128, %s107_s0, [#allocation3]  }
 0x110   :  { %143 = dma.done.wait [#allocation3], 128  }
 0x111   :  { %144 = vsyncadd [#allocation3], 4294967168 }
 0x112   :  { %114 = vsyncpa [#allocation3], 1 }

</bundles_post_ra>
